<compile_context>
chip_gen: v5e
topology: v5e:2x2
jax: 0.10.0
libtpu: 0.0.40
codegen_flags: <defaults>
</compile_context>

<pallas_src>
import jax
import jax.numpy as jnp
from jax import lax
from jax.experimental import pallas as pl
from jax.experimental.pallas import tpu as pltpu


def _value_kernel(x_ref, w_ref, o_ref):
    """One M-tile of y = x @ W.T.

    x_ref: (tm, K)  activation tile
    w_ref: (N, K)   full weight, native nn.Linear layout, VMEM-resident
    o_ref: (tm, N)  output tile
    """
    # Contract along K with the RHS kept in its native (N, K) layout
    # (transposed-RHS matmul on the MXU).  Single K step -> write the result
    # straight to the output; no scratch accumulator needed.
    # NOTE: default MXU matmul precision; at the Value-module K (dim_input=32)
    # this stays well within 1e-4 of a Precision.HIGHEST reference.
    o_ref[...] = lax.dot_general(
        x_ref[...], w_ref[...],
        dimension_numbers=(((1,), (1,)), ((), ())),
        preferred_element_type=jnp.float32,
    ).astype(o_ref.dtype)


_TM_CAP = 512              # M-tile cap (multiple of 8); modest VMEM footprint
_W_VMEM_BUDGET = 16 << 20  # keep W fully resident only while it is small


def _value_matmul(x2d, weight):
    """y = x2d @ weight.T with the (N, K) weight kept fully VMEM-resident.

    x2d:    (M, K) float32
    weight: (N, K) float32  (PyTorch nn.Linear layout)
    """
    M, K = x2d.shape
    N, K2 = weight.shape
    assert K == K2, (K, K2)
    # This design assumes the weight comfortably fits VMEM (true for the Value
    # module: dim_val x dim_input f32 is KiB-scale on every TPU generation).
    assert weight.size * weight.dtype.itemsize <= _W_VMEM_BUDGET, (
        "Value weight too large for the VMEM-resident kernel; re-tile over K/N.")

    # tm: full M when small (full-dim block is always legal), else a multiple
    # of 8; the last partial block (if M % tm != 0) is masked by Pallas.
    tm = M if M <= _TM_CAP else _TM_CAP
    grid = (pl.cdiv(M, tm),)

    return pl.pallas_call(
        _value_kernel,
        out_shape=jax.ShapeDtypeStruct((M, N), jnp.float32),
        grid_spec=pltpu.PrefetchScalarGridSpec(
            num_scalar_prefetch=0,
            grid=grid,
            in_specs=[
                pl.BlockSpec((tm, K), lambda i: (i, 0)),  # x tile, full K
                pl.BlockSpec((N, K), lambda i: (0, 0)),   # full W, DMA'd once
            ],
            out_specs=pl.BlockSpec((tm, N), lambda i: (i, 0)),
        ),
        compiler_params=pltpu.CompilerParams(
            dimension_semantics=("parallel",)),  # shards across TCs when M/tm >= 2
    )(x2d, weight)


def value_forward(x, weight):
    """Pallas equivalent of Value.forward: y = x @ weight.T (nn.Linear, no bias).

    x:      (..., dim_input) float32
    weight: (dim_val, dim_input) -- native PyTorch nn.Linear layout (no
            wrapper-side transpose pass; the kernel contracts along the last
            axis of both operands).
    """
    *lead, K = x.shape
    N = weight.shape[0]
    x2d = x.reshape(-1, K).astype(jnp.float32)
    y2d = _value_matmul(x2d, weight.astype(jnp.float32))
    return y2d.reshape(*lead, N)


if __name__ == "__main__":
    # Small shapes consistent with how `Value` is used in the TFT model:
    # (batch, seq, dim_input) activations projected to dim_val.
    B, T = 2, 8
    dim_input, dim_val = 32, 128

    key = jax.random.PRNGKey(0)
    kx, kw = jax.random.split(key)
    x = jax.random.normal(kx, (B, T, dim_input), jnp.float32)
    # nn.Linear(dim_input, dim_val, bias=False).weight has shape (dim_val, dim_input)
    weight = (jax.random.normal(kw, (dim_val, dim_input), jnp.float32)
              / jnp.sqrt(jnp.float32(dim_input)))

    y = jax.jit(value_forward)(x, weight)
    y = jax.block_until_ready(y)

    # Reference: torch Linear(bias=False) semantics, y = x @ W.T
    ref = jnp.einsum("btk,nk->btn", x, weight,
                     precision=lax.Precision.HIGHEST)
    assert y.shape == (B, T, dim_val), y.shape
    max_err = float(jnp.max(jnp.abs(y - ref)))
    assert jnp.allclose(y, ref, rtol=1e-4, atol=1e-4), max_err
    print("KERNEL_OK")
</pallas_src>

<mosaic_0001>
module attributes {stable_mosaic.version = 11 : i64} {
  func.func @_value_kernel(%arg0: i32, %arg1: memref<16x32xf32, #tpu.memory_space<vmem>>, %arg2: memref<128x32xf32, #tpu.memory_space<vmem>>, %arg3: memref<16x128xf32, #tpu.memory_space<vmem>>) attributes {dimension_semantics = [#tpu.dimension_semantics<parallel>], iteration_bounds = array<i64: 1>, scalar_prefetch = 0 : i64, scratch_operands = 0 : i64, tpu.core_type = #tpu.core_type<tc>, window_params = [{transform_indices = @transform_0, window_bounds = array<i64: 16, 32>}, {pipeline_mode = #tpu.pipeline_mode<synchronous>, transform_indices = @transform_1, window_bounds = array<i64: 128, 32>}, {transform_indices = @transform_2, window_bounds = array<i64: 16, 128>}]} {
    %c0 = arith.constant 0 : index
    %c0_0 = arith.constant 0 : index
    %0 = vector.load %arg1[%c0, %c0_0] : memref<16x32xf32, #tpu.memory_space<vmem>>, vector<16x32xf32>
    %c0_1 = arith.constant 0 : index
    %c0_2 = arith.constant 0 : index
    %1 = vector.load %arg2[%c0_1, %c0_2] : memref<128x32xf32, #tpu.memory_space<vmem>>, vector<128x32xf32>
    %cst = arith.constant dense<0.000000e+00> : vector<16x128xf32>
    %2 = tpu.matmul %0, %1, %cst {dimension_numbers = #tpu.dot_dimension_numbers<[1], [1], [0], [0], [0, 0, 1, 0], [], []>} : vector<16x32xf32>, vector<128x32xf32>, vector<16x128xf32> -> vector<16x128xf32>
    %c0_3 = arith.constant 0 : index
    %c0_4 = arith.constant 0 : index
    %3 = vector.load %arg3[%c0_3, %c0_4] : memref<16x128xf32, #tpu.memory_space<vmem>>, vector<16x128xf32>
    tpu.vector_store %arg3[%c0_3, %c0_4], %2 {strides = array<i32>} : memref<16x128xf32, #tpu.memory_space<vmem>>, vector<16x128xf32>,
    return
  }
  func.func @transform_0(%arg0: i32) -> (i32, i32) {
    %c0_i32 = arith.constant 0 : i32
    %c0_i32_0 = arith.constant 0 : i32
    return %arg0, %c0_i32 : i32, i32
  }
  func.func @transform_1(%arg0: i32) -> (i32, i32) {
    %c0_i32 = arith.constant 0 : i32
    %c0_i32_0 = arith.constant 0 : i32
    %c0_i32_1 = arith.constant 0 : i32
    return %c0_i32, %c0_i32_0 : i32, i32
  }
  func.func @transform_2(%arg0: i32) -> (i32, i32) {
    %c0_i32 = arith.constant 0 : i32
    %c0_i32_0 = arith.constant 0 : i32
    return %arg0, %c0_i32 : i32, i32
  }
}

</mosaic_0001>

<bundles_post_ra>
// kernel: value_forward.1
= control target key start
LH: loop header
LB: loop body
LE: loop exit
PB: predicated region body
PF: predicated region fallthrough
CT: control target
= control target key end

     0   :  { %vm30_vm0 = vcmask 261120   ;;  %s300_s0 = inlined_call_operand.vmem [shape: f32[16,32], index: 0, kind: input, shape index: {}]   ;;  %s301_s1 = inlined_call_operand.vmem [shape: f32[128,32], index: 1, kind: input, shape index: {}]   ;;  %s302_s2 = inlined_call_operand.hbm [shape: f32[16,128], index: 2, kind: output, shape index: {}]  }
   0x1   :  { %v29_v0 = vld [vmem:[%s301_s1 + $0x78] sm:$0xff]  ;;  %v28_v1 = vld [vmem:[%s301_s1 + $0x70] sm:$0xff] }
   0x2   :  { %128 = vmatpush.xpose.msk.msra.mxu0 %vm30_vm0, %v29_v0  ;;  %146 = vmatpush.xpose.msk.msra.mxu1 %vm30_vm0, %v29_v0 }
   0x3   :  { %7 = vsyncpa [#allocation3], 0  ;;  %v27_v2 = vld [vmem:[%s301_s1 + $0x68] sm:$0xff]  ;;  %v26_v3 = vld [vmem:[%s301_s1 + $0x60] sm:$0xff]  ;;  %s191_s17 = smov [#allocation2]   ;;  %s116_s20 = sshll.u32 %s302_s2, 4  ;;  %s117_s20 = int_to_ptr.hbm [resolvable:$true] %s116_s20 }
   0x4   :  { %v25_v4 = vld [vmem:[%s301_s1 + $0x58] sm:$0xff]  ;;  %v24_v5 = vld [vmem:[%s301_s1 + $0x50] sm:$0xff]  ;;  %v23_v6 = vld [vmem:[%s301_s1 + $0x48] sm:$0xff]  ;;  %s114_s18 = sshll.u32 %s191_s17, 4  ;;  %s192_s21 = smov 128   ;;  %s115_s18 = int_to_ptr.vmem [resolvable:$true] %s114_s18 }
   0x5   :  { %v22_v7 = vld [vmem:[%s301_s1 + $0x40] sm:$0xff]  ;;  %v21_v8 = vld [vmem:[%s301_s1 + $0x38] sm:$0xff]  ;;  %v20_v9 = vld [vmem:[%s301_s1 + $0x30] sm:$0xff]  ;;  %s193_s22 = smov 8  }
   0x6   :  { %129 = vmatpush.xpose.msk.msra.mxu0 %vm30_vm0, %v28_v1  ;;  %147 = vmatpush.xpose.msk.msra.mxu1 %vm30_vm0, %v28_v1  ;;  %v19_v10 = vld [vmem:[%s301_s1 + $0x28] sm:$0xff]  ;;  %v18_v11 = vld [vmem:[%s301_s1 + $0x20] sm:$0xff]  ;;  %v17_v12 = vld [vmem:[%s301_s1 + $0x18] sm:$0xff] }
   0x7   :  { %v16_v13 = vld [vmem:[%s301_s1 + $0x10] sm:$0xff]  ;;  %v15_v14 = vld [vmem:[%s301_s1 + $0x8] sm:$0xff]  ;;  %v14_v15 = vld [vmem:[%s301_s1] sm:$0xff] }
   0x8   :  { %v12_v16 = vld [vmem:[%s300_s0] sm:$0xff]  ;;  %v13_v17 = vld [vmem:[%s300_s0 + $0x8] sm:$0xff] }
   0xa   :  { %130 = vmatpush.xpose.msk.msra.mxu0 %vm30_vm0, %v27_v2  ;;  %148 = vmatpush.xpose.msk.msra.mxu1 %vm30_vm0, %v27_v2 }
   0xe   :  { %131 = vmatpush.xpose.msk.msra.mxu0 %vm30_vm0, %v26_v3  ;;  %149 = vmatpush.xpose.msk.msra.mxu1 %vm30_vm0, %v26_v3 }
  0x12   :  { %132 = vmatpush.xpose.msk.msra.mxu0 %vm30_vm0, %v25_v4  ;;  %150 = vmatpush.xpose.msk.msra.mxu1 %vm30_vm0, %v25_v4 }
  0x16   :  { %133 = vmatpush.xpose.msk.msra.mxu0 %vm30_vm0, %v24_v5  ;;  %151 = vmatpush.xpose.msk.msra.mxu1 %vm30_vm0, %v24_v5 }
  0x1a   :  { %134 = vmatpush.xpose.msk.msra.mxu0 %vm30_vm0, %v23_v6  ;;  %152 = vmatpush.xpose.msk.msra.mxu1 %vm30_vm0, %v23_v6 }
  0x1e   :  { %135 = vmatpush.xpose.msk.msra.mxu0 %vm30_vm0, %v22_v7  ;;  %153 = vmatpush.xpose.msk.msra.mxu1 %vm30_vm0, %v22_v7 }
  0x22   :  { %136 = vmatpush.xpose.msk.msra.mxu0 %vm30_vm0, %v21_v8  ;;  %154 = vmatpush.xpose.msk.msra.mxu1 %vm30_vm0, %v21_v8 }
  0x26   :  { %137 = vmatpush.xpose.msk.msra.mxu0 %vm30_vm0, %v20_v9  ;;  %155 = vmatpush.xpose.msk.msra.mxu1 %vm30_vm0, %v20_v9 }
  0x2a   :  { %138 = vmatpush.xpose.msk.msra.mxu0 %vm30_vm0, %v19_v10  ;;  %156 = vmatpush.xpose.msk.msra.mxu1 %vm30_vm0, %v19_v10 }
  0x2e   :  { %139 = vmatpush.xpose.msk.msra.mxu0 %vm30_vm0, %v18_v11  ;;  %157 = vmatpush.xpose.msk.msra.mxu1 %vm30_vm0, %v18_v11 }
  0x32   :  { %140 = vmatpush.xpose.msk.msra.mxu0 %vm30_vm0, %v17_v12  ;;  %158 = vmatpush.xpose.msk.msra.mxu1 %vm30_vm0, %v17_v12 }
  0x36   :  { %141 = vmatpush.xpose.msk.msra.mxu0 %vm30_vm0, %v16_v13  ;;  %159 = vmatpush.xpose.msk.msra.mxu1 %vm30_vm0, %v16_v13 }
  0x3a   :  { %142 = vmatpush.xpose.msk.msra.mxu0 %vm30_vm0, %v15_v14  ;;  %160 = vmatpush.xpose.msk.msra.mxu1 %vm30_vm0, %v15_v14 }
  0x3e   :  { %143 = vmatpush.xpose.msk.msra.mxu0 %vm30_vm0, %v14_v15  ;;  %161 = vmatpush.xpose.msk.msra.mxu1 %vm30_vm0, %v14_v15 }
  0x41   :  { %144 = vmatmul.msk.f32.vlgmr.msra.gmra.mxu0 %vm30_vm0, %v12_v16  ;;  %145 = vmatmul.msk.f32.vlgmr.msra.gmra.mxu1 %vm30_vm0, %v13_v17 }
  0xbe   :  { %v102_v18 = vpop.f32.mrf.mxu0  ;;  %v105_v19 = vpop.f32.mrf.mxu1 }
  0xbf   :  { %108 = vst [vmem:[#allocation2] sm:$0xff] %v102_v18 }
  0xc0   :  { %109 = vst [vmem:[#allocation2 + $0x8] sm:$0xff] %v105_v19 }
  0xc1   :  { %122 = dma.vmem_to_hbm [thread:$0]  %s115_s18, 256, %s117_s20, [#allocation3], %s192_s21, %s192_s21, %s193_s22  }
  0xc2   :  { %189 = dma.done.wait [#allocation3], 256  }
  0xc3   :  { %190 = vsyncadd [#allocation3], 4294967040 }
  0xc4   :  { %127 = vsyncpa [#allocation3], 1 }

</bundles_post_ra>
